<compile_context>
chip_gen: v7x
topology: tpu7x:2x2x1
jax: 0.10.0
libtpu: 0.0.40
codegen_flags: <defaults>
</compile_context>

<pallas_src>
import functools

import jax
import jax.numpy as jnp
from jax.experimental import pallas as pl
from jax.experimental.pallas import tpu as pltpu


def _round_up(n, m):
    return ((n + m - 1) // m) * m


def _sublane_pack(dtype):
    # Rows per vreg: 8 for 4-byte, 16 for 2-byte, 32 for 1-byte dtypes.
    return max(8, 32 // jnp.dtype(dtype).itemsize)


# ----------------------------------------------------------------------------
# Kernels
# ----------------------------------------------------------------------------
def _encoder_kernel_fused(x_ref, w1_ref, b1_ref, wh_ref, bh_ref, out_ref):
    # x tile: (block_b, in_sz); W1: (in_sz, hid_p); fused heads: (hid_p, head_p)
    x = x_ref[...].astype(w1_ref.dtype)
    h = jnp.dot(x, w1_ref[...], preferred_element_type=jnp.float32) + b1_ref[...]
    h = jnp.maximum(h, 0.0)                                      # relu, f32, lane-dense
    out = jnp.dot(h.astype(wh_ref.dtype), wh_ref[...],
                  preferred_element_type=jnp.float32) + bh_ref[...]
    out_ref[...] = out.astype(out_ref.dtype)                     # single lane-dense store


def _encoder_kernel_split(x_ref, w1_ref, b1_ref, wh_ref, bh_ref, mu_ref, sig_ref):
    # Same fused compute, but latent_size % 128 == 0 so mu / sigma are written
    # as two separate lane-dense outputs (no padded slab, no wrapper slices).
    x = x_ref[...].astype(w1_ref.dtype)
    h = jnp.dot(x, w1_ref[...], preferred_element_type=jnp.float32) + b1_ref[...]
    h = jnp.maximum(h, 0.0)
    out = jnp.dot(h.astype(wh_ref.dtype), wh_ref[...],
                  preferred_element_type=jnp.float32) + bh_ref[...]
    lat = mu_ref.shape[-1]
    mu_ref[...] = out[:, :lat].astype(mu_ref.dtype)
    sig_ref[...] = out[:, lat:2 * lat].astype(sig_ref.dtype)


# ----------------------------------------------------------------------------
# One-time parameter layout prep
# ----------------------------------------------------------------------------
def prepare_encoder_params(w1, b1, wmu, bmu, wsig, bsig, dtype=jnp.bfloat16):
    """One-time layout prep.

    PyTorch nn.Linear weights are (out, in); transpose to (in, out), fuse the
    mu/sigma heads along the output dim, zero-pad hid and the fused head dim to
    multiples of 128 lanes.  Weights are stored in `dtype` (bf16 default for
    MXU rate / halved VMEM+DMA); biases stay f32 (added to the f32 accumulator).
    Zero padding is mathematically exact.
    """
    hid, in_sz = w1.shape
    lat = wmu.shape[0]

    hid_p = _round_up(hid, 128)
    head = 2 * lat
    head_p = _round_up(head, 128)

    w1_p = jnp.zeros((in_sz, hid_p), dtype).at[:, :hid].set(w1.T.astype(dtype))
    b1_p = jnp.zeros((1, hid_p), jnp.float32).at[0, :hid].set(b1.astype(jnp.float32))

    wh = jnp.concatenate([wmu.T, wsig.T], axis=1)             # (hid, 2*lat)
    bh = jnp.concatenate([bmu, bsig], axis=0)                 # (2*lat,)
    wh_p = jnp.zeros((hid_p, head_p), dtype).at[:hid, :head].set(wh.astype(dtype))
    bh_p = jnp.zeros((1, head_p), jnp.float32).at[0, :head].set(bh.astype(jnp.float32))

    return (w1_p, b1_p, wh_p, bh_p)


# ----------------------------------------------------------------------------
# pallas_call wrapper
# ----------------------------------------------------------------------------
@functools.partial(jax.jit,
                   static_argnames=("latent_size", "block_b", "single_buffer_weights"))
def _encoder_forward_impl(x, w1_p, b1_p, wh_p, bh_p, *, latent_size, block_b,
                          single_buffer_weights):
    B, in_sz = x.shape
    hid_p = w1_p.shape[1]
    head_p = wh_p.shape[1]

    grid = (pl.cdiv(B, block_b),)

    # Grid-invariant operands: single buffer (no pointless double-buffering).
    if single_buffer_weights and hasattr(pl, "Buffered"):
        resident = {"pipeline_mode": pl.Buffered(1)}
        weight_bufs = 1
    else:
        resident = {}
        weight_bufs = 2

    in_specs = [
        pl.BlockSpec((block_b, in_sz), lambda i: (i, 0)),                  # x batch tile
        pl.BlockSpec((in_sz, hid_p), lambda i: (0, 0), **resident),        # W1 (resident)
        pl.BlockSpec((1, hid_p), lambda i: (0, 0), **resident),            # b1 (f32)
        pl.BlockSpec((hid_p, head_p), lambda i: (0, 0), **resident),       # [Wmu|Wsig]
        pl.BlockSpec((1, head_p), lambda i: (0, 0), **resident),           # [bmu|bsig] (f32)
    ]

    # Explicit VMEM budget from the actual buffers (+50% headroom), capped so it
    # is a legal request on every generation (v7x: 64 MiB physical per TC).
    w_bytes = jnp.dtype(w1_p.dtype).itemsize
    x_bytes = jnp.dtype(x.dtype).itemsize
    out_bytes = jnp.dtype(x.dtype).itemsize
    vmem_bytes = (
        2 * block_b * in_sz * x_bytes                                  # x tile, 2 bufs
        + 2 * block_b * head_p * out_bytes                             # out tile(s), 2 bufs
        + weight_bufs * (in_sz * hid_p + hid_p * head_p) * w_bytes     # weights
        + (hid_p + head_p) * 4                                         # f32 biases
        + block_b * (hid_p + head_p) * 4                               # f32 h + accumulator
    )
    vmem_limit = min(max(int(vmem_bytes * 1.5), 4 * 1024 * 1024), 64 * 1024 * 1024)

    split_heads = (latent_size % 128 == 0)
    if split_heads:
        kernel = _encoder_kernel_split
        out_shape = (jax.ShapeDtypeStruct((B, latent_size), x.dtype),
                     jax.ShapeDtypeStruct((B, latent_size), x.dtype))
        out_specs = [pl.BlockSpec((block_b, latent_size), lambda i: (i, 0)),
                     pl.BlockSpec((block_b, latent_size), lambda i: (i, 0))]
    else:
        kernel = _encoder_kernel_fused
        out_shape = jax.ShapeDtypeStruct((B, head_p), x.dtype)
        out_specs = pl.BlockSpec((block_b, head_p), lambda i: (i, 0))

    result = pl.pallas_call(
        kernel,
        out_shape=out_shape,
        grid_spec=pltpu.PrefetchScalarGridSpec(
            num_scalar_prefetch=0,
            grid=grid,
            in_specs=in_specs,
            out_specs=out_specs,
        ),
        compiler_params=pltpu.CompilerParams(
            dimension_semantics=("parallel",),     # batch steps shard across v7x TCs
            vmem_limit_bytes=vmem_limit),
    )(x, w1_p, b1_p, wh_p, bh_p)

    if split_heads:
        mu, sigma = result
    else:
        # latent not a lane multiple: fused padded slab, slice here (API returns
        # mu/sigma separately, matching the PyTorch module).
        mu = result[:, :latent_size]
        sigma = result[:, latent_size:2 * latent_size]
    return mu, sigma


def encoder_forward(x, params, latent_size, *, block_b=512):
    """x: (B, input_size); params from prepare_encoder_params."""
    B = x.shape[0]
    pack = _sublane_pack(x.dtype)
    # Aim for >= 2 grid steps (so the parallel axis can use both v7x TCs) while
    # never exceeding block_b, rounded to the sublane packing of x's dtype.
    half = -(-B // 2)
    block_b_eff = max(pack, min(block_b, _round_up(half, pack)))
    try:
        return _encoder_forward_impl(x, *params, latent_size=latent_size,
                                     block_b=block_b_eff,
                                     single_buffer_weights=True)
    except Exception:
        # Fallback for jax versions whose pallas_call lowering does not accept
        # pipeline_mode=pl.Buffered(1); costs only extra VMEM, not correctness.
        return _encoder_forward_impl(x, *params, latent_size=latent_size,
                                     block_b=block_b_eff,
                                     single_buffer_weights=False)


# ----------------------------------------------------------------------------
# Demo / correctness checks
# ----------------------------------------------------------------------------
if __name__ == "__main__":
    root = jax.random.PRNGKey(0)

    def run_case(seed, B, in_sz, hid, lat, dtype, atol):
        ks = jax.random.split(jax.random.fold_in(root, seed), 7)
        x = jax.random.normal(ks[0], (B, in_sz), jnp.float32)
        # PyTorch nn.Linear layout: (out, in)
        w1 = jax.random.normal(ks[1], (hid, in_sz), jnp.float32) * 0.1
        b1 = jax.random.normal(ks[2], (hid,), jnp.float32) * 0.1
        wmu = jax.random.normal(ks[3], (lat, hid), jnp.float32) * 0.1
        bmu = jax.random.normal(ks[4], (lat,), jnp.float32) * 0.1
        wsig = jax.random.normal(ks[5], (lat, hid), jnp.float32) * 0.1
        bsig = jax.random.normal(ks[6], (lat,), jnp.float32) * 0.1

        params = prepare_encoder_params(w1, b1, wmu, bmu, wsig, bsig, dtype=dtype)
        mu, sigma = encoder_forward(x, params, lat)
        jax.block_until_ready((mu, sigma))

        h = jnp.maximum(x @ w1.T + b1, 0.0)
        mu_ref = h @ wmu.T + bmu
        sig_ref = h @ wsig.T + bsig
        assert mu.shape == (B, lat) and sigma.shape == (B, lat)
        assert jnp.allclose(mu, mu_ref, atol=atol), f"mu mismatch (case {seed})"
        assert jnp.allclose(sigma, sig_ref, atol=atol), f"sigma mismatch (case {seed})"

    # Fused-slab path (latent not a multiple of 128), f32 weights, tight check.
    run_case(1, B=8, in_sz=32, hid=64, lat=16, dtype=jnp.float32, atol=1e-5)
    # Split two-output path (latent % 128 == 0) with a 2-step batch grid.
    run_case(2, B=16, in_sz=32, hid=64, lat=128, dtype=jnp.float32, atol=1e-5)
    # Default bf16-weight path (f32 biases + f32 accumulation), looser tolerance.
    run_case(3, B=8, in_sz=32, hid=64, lat=16, dtype=jnp.bfloat16, atol=5e-2)

    print("KERNEL_OK")
</pallas_src>

<mosaic_0001>
module attributes {stable_mosaic.version = 11 : i64} {
  func.func @_encoder_kernel_fused(%arg0: i32, %arg1: memref<8x32xf32, #tpu.memory_space<vmem>>, %arg2: memref<32x128xf32, #tpu.memory_space<vmem>>, %arg3: memref<1x128xf32, #tpu.memory_space<vmem>>, %arg4: memref<128x128xf32, #tpu.memory_space<vmem>>, %arg5: memref<1x128xf32, #tpu.memory_space<vmem>>, %arg6: memref<8x128xf32, #tpu.memory_space<vmem>>) attributes {dimension_semantics = [#tpu.dimension_semantics<parallel>], iteration_bounds = array<i64: 1>, scalar_prefetch = 0 : i64, scratch_operands = 0 : i64, tpu.core_type = #tpu.core_type<tc>, window_params = [{transform_indices = @transform_0, window_bounds = array<i64: 8, 32>}, {pipeline_mode = #tpu.pipeline_mode<synchronous>, transform_indices = @transform_1, window_bounds = array<i64: 32, 128>}, {pipeline_mode = #tpu.pipeline_mode<synchronous>, transform_indices = @transform_2, window_bounds = array<i64: 1, 128>}, {pipeline_mode = #tpu.pipeline_mode<synchronous>, transform_indices = @transform_3, window_bounds = array<i64: 128, 128>}, {pipeline_mode = #tpu.pipeline_mode<synchronous>, transform_indices = @transform_4, window_bounds = array<i64: 1, 128>}, {transform_indices = @transform_5, window_bounds = array<i64: 8, 128>}]} {
    %c0 = arith.constant 0 : index
    %c0_0 = arith.constant 0 : index
    %0 = vector.load %arg1[%c0, %c0_0] : memref<8x32xf32, #tpu.memory_space<vmem>>, vector<8x32xf32>
    %c0_1 = arith.constant 0 : index
    %c0_2 = arith.constant 0 : index
    %1 = vector.load %arg2[%c0_1, %c0_2] : memref<32x128xf32, #tpu.memory_space<vmem>>, vector<32x128xf32>
    %cst = arith.constant dense<0.000000e+00> : vector<8x128xf32>
    %2 = tpu.matmul %0, %1, %cst {dimension_numbers = #tpu.dot_dimension_numbers<[1], [0], [0], [1], [0, 0, 1, 1], [], []>} : vector<8x32xf32>, vector<32x128xf32>, vector<8x128xf32> -> vector<8x128xf32>
    %c0_3 = arith.constant 0 : index
    %c0_4 = arith.constant 0 : index
    %3 = vector.load %arg3[%c0_3, %c0_4] : memref<1x128xf32, #tpu.memory_space<vmem>>, vector<1x128xf32>
    %4 = vector.broadcast %3 : vector<1x128xf32> to vector<8x128xf32>
    %5 = arith.addf %2, %4 : vector<8x128xf32>
    %cst_5 = arith.constant 0.000000e+00 : f32
    %6 = vector.broadcast %cst_5 : f32 to vector<8x128xf32>
    %7 = arith.maximumf %5, %6 : vector<8x128xf32>
    %c0_6 = arith.constant 0 : index
    %c0_7 = arith.constant 0 : index
    %8 = vector.load %arg4[%c0_6, %c0_7] : memref<128x128xf32, #tpu.memory_space<vmem>>, vector<128x128xf32>
    %cst_8 = arith.constant dense<0.000000e+00> : vector<8x128xf32>
    %9 = tpu.matmul %7, %8, %cst_8 {dimension_numbers = #tpu.dot_dimension_numbers<[1], [0], [0], [1], [0, 0, 1, 1], [], []>} : vector<8x128xf32>, vector<128x128xf32>, vector<8x128xf32> -> vector<8x128xf32>
    %c0_9 = arith.constant 0 : index
    %c0_10 = arith.constant 0 : index
    %10 = vector.load %arg5[%c0_9, %c0_10] : memref<1x128xf32, #tpu.memory_space<vmem>>, vector<1x128xf32>
    %11 = vector.broadcast %10 : vector<1x128xf32> to vector<8x128xf32>
    %12 = arith.addf %9, %11 : vector<8x128xf32>
    %c0_11 = arith.constant 0 : index
    %c0_12 = arith.constant 0 : index
    %13 = vector.load %arg6[%c0_11, %c0_12] : memref<8x128xf32, #tpu.memory_space<vmem>>, vector<8x128xf32>
    tpu.vector_store %arg6[%c0_11, %c0_12], %12 {strides = array<i32>} : memref<8x128xf32, #tpu.memory_space<vmem>>, vector<8x128xf32>,
    return
  }
  func.func @transform_0(%arg0: i32) -> (i32, i32) {
    %c0_i32 = arith.constant 0 : i32
    %c0_i32_0 = arith.constant 0 : i32
    return %arg0, %c0_i32 : i32, i32
  }
  func.func @transform_1(%arg0: i32) -> (i32, i32) {
    %c0_i32 = arith.constant 0 : i32
    %c0_i32_0 = arith.constant 0 : i32
    %c0_i32_1 = arith.constant 0 : i32
    return %c0_i32, %c0_i32_0 : i32, i32
  }
  func.func @transform_2(%arg0: i32) -> (i32, i32) {
    %c0_i32 = arith.constant 0 : i32
    %c0_i32_0 = arith.constant 0 : i32
    %c0_i32_1 = arith.constant 0 : i32
    return %c0_i32, %c0_i32_0 : i32, i32
  }
  func.func @transform_3(%arg0: i32) -> (i32, i32) {
    %c0_i32 = arith.constant 0 : i32
    %c0_i32_0 = arith.constant 0 : i32
    %c0_i32_1 = arith.constant 0 : i32
    return %c0_i32, %c0_i32_0 : i32, i32
  }
  func.func @transform_4(%arg0: i32) -> (i32, i32) {
    %c0_i32 = arith.constant 0 : i32
    %c0_i32_0 = arith.constant 0 : i32
    %c0_i32_1 = arith.constant 0 : i32
    return %c0_i32, %c0_i32_0 : i32, i32
  }
  func.func @transform_5(%arg0: i32) -> (i32, i32) {
    %c0_i32 = arith.constant 0 : i32
    %c0_i32_0 = arith.constant 0 : i32
    return %arg0, %c0_i32 : i32, i32
  }
}

module attributes {stable_mosaic.version = 11 : i64} {
  func.func @_encoder_kernel_fused(%arg0: i32, %arg1: memref<8x32xf32, #tpu.memory_space<vmem>>, %arg2: memref<32x128xf32, #tpu.memory_space<vmem>>, %arg3: memref<1x128xf32, #tpu.memory_space<vmem>>, %arg4: memref<128x128xf32, #tpu.memory_space<vmem>>, %arg5: memref<1x128xf32, #tpu.memory_space<vmem>>, %arg6: memref<8x128xf32, #tpu.memory_space<vmem>>) attributes {dimension_semantics = [#tpu.dimension_semantics<parallel>], iteration_bounds = array<i64: 1>, scalar_prefetch = 0 : i64, scratch_operands = 0 : i64, tpu.core_type = #tpu.core_type<tc>, window_params = [{transform_indices = @transform_0, window_bounds = array<i64: 8, 32>}, {pipeline_mode = #tpu.pipeline_mode<synchronous>, transform_indices = @transform_1, window_bounds = array<i64: 32, 128>}, {pipeline_mode = #tpu.pipeline_mode<synchronous>, transform_indices = @transform_2, window_bounds = array<i64: 1, 128>}, {pipeline_mode = #tpu.pipeline_mode<synchronous>, transform_indices = @transform_3, window_bounds = array<i64: 128, 128>}, {pipeline_mode = #tpu.pipeline_mode<synchronous>, transform_indices = @transform_4, window_bounds = array<i64: 1, 128>}, {transform_indices = @transform_5, window_bounds = array<i64: 8, 128>}]} {
    %c0 = arith.constant 0 : index
    %c0_0 = arith.constant 0 : index
    %0 = vector.load %arg1[%c0, %c0_0] : memref<8x32xf32, #tpu.memory_space<vmem>>, vector<8x32xf32>
    %c0_1 = arith.constant 0 : index
    %c0_2 = arith.constant 0 : index
    %1 = vector.load %arg2[%c0_1, %c0_2] : memref<32x128xf32, #tpu.memory_space<vmem>>, vector<32x128xf32>
    %cst = arith.constant dense<0.000000e+00> : vector<8x128xf32>
    %2 = tpu.matmul %0, %1, %cst {dimension_numbers = #tpu.dot_dimension_numbers<[1], [0], [0], [1], [0, 0, 1, 1], [], []>} : vector<8x32xf32>, vector<32x128xf32>, vector<8x128xf32> -> vector<8x128xf32>
    %c0_3 = arith.constant 0 : index
    %c0_4 = arith.constant 0 : index
    %3 = vector.load %arg3[%c0_3, %c0_4] : memref<1x128xf32, #tpu.memory_space<vmem>>, vector<1x128xf32>
    %4 = vector.broadcast %3 : vector<1x128xf32> to vector<8x128xf32>
    %5 = arith.addf %2, %4 : vector<8x128xf32>
    %cst_5 = arith.constant 0.000000e+00 : f32
    %6 = vector.broadcast %cst_5 : f32 to vector<8x128xf32>
    %7 = arith.maximumf %5, %6 : vector<8x128xf32>
    %c0_6 = arith.constant 0 : index
    %c0_7 = arith.constant 0 : index
    %8 = vector.load %arg4[%c0_6, %c0_7] : memref<128x128xf32, #tpu.memory_space<vmem>>, vector<128x128xf32>
    %cst_8 = arith.constant dense<0.000000e+00> : vector<8x128xf32>
    %9 = tpu.matmul %7, %8, %cst_8 {dimension_numbers = #tpu.dot_dimension_numbers<[1], [0], [0], [1], [0, 0, 1, 1], [], []>} : vector<8x128xf32>, vector<128x128xf32>, vector<8x128xf32> -> vector<8x128xf32>
    %c0_9 = arith.constant 0 : index
    %c0_10 = arith.constant 0 : index
    %10 = vector.load %arg5[%c0_9, %c0_10] : memref<1x128xf32, #tpu.memory_space<vmem>>, vector<1x128xf32>
    %11 = vector.broadcast %10 : vector<1x128xf32> to vector<8x128xf32>
    %12 = arith.addf %9, %11 : vector<8x128xf32>
    %c0_11 = arith.constant 0 : index
    %c0_12 = arith.constant 0 : index
    %13 = vector.load %arg6[%c0_11, %c0_12] : memref<8x128xf32, #tpu.memory_space<vmem>>, vector<8x128xf32>
    tpu.vector_store %arg6[%c0_11, %c0_12], %12 {strides = array<i32>} : memref<8x128xf32, #tpu.memory_space<vmem>>, vector<8x128xf32>,
    return
  }
  func.func @transform_0(%arg0: i32) -> (i32, i32) {
    %c0_i32 = arith.constant 0 : i32
    %c0_i32_0 = arith.constant 0 : i32
    return %arg0, %c0_i32 : i32, i32
  }
  func.func @transform_1(%arg0: i32) -> (i32, i32) {
    %c0_i32 = arith.constant 0 : i32
    %c0_i32_0 = arith.constant 0 : i32
    %c0_i32_1 = arith.constant 0 : i32
    return %c0_i32, %c0_i32_0 : i32, i32
  }
  func.func @transform_2(%arg0: i32) -> (i32, i32) {
    %c0_i32 = arith.constant 0 : i32
    %c0_i32_0 = arith.constant 0 : i32
    %c0_i32_1 = arith.constant 0 : i32
    return %c0_i32, %c0_i32_0 : i32, i32
  }
  func.func @transform_3(%arg0: i32) -> (i32, i32) {
    %c0_i32 = arith.constant 0 : i32
    %c0_i32_0 = arith.constant 0 : i32
    %c0_i32_1 = arith.constant 0 : i32
    return %c0_i32, %c0_i32_0 : i32, i32
  }
  func.func @transform_4(%arg0: i32) -> (i32, i32) {
    %c0_i32 = arith.constant 0 : i32
    %c0_i32_0 = arith.constant 0 : i32
    %c0_i32_1 = arith.constant 0 : i32
    return %c0_i32, %c0_i32_0 : i32, i32
  }
  func.func @transform_5(%arg0: i32) -> (i32, i32) {
    %c0_i32 = arith.constant 0 : i32
    %c0_i32_0 = arith.constant 0 : i32
    return %arg0, %c0_i32 : i32, i32
  }
}

</mosaic_0001>

<bundles_post_ra>
// kernel: _encoder_forward_impl.1
= control target key start
LH: loop header
LB: loop body
LE: loop exit
PB: predicated region body
PF: predicated region fallthrough
CT: control target
= control target key end

     0   :  { %10 = vsyncpa [#allocation3], 0  ;;  %s514_s0 = inlined_call_operand.hbm [shape: f32[8,32], index: 0, kind: input, shape index: {}]   ;;  %s515_s1 = inlined_call_operand.hbm [shape: f32[32,128], index: 1, kind: input, shape index: {}]   ;;  %s516_s2 = inlined_call_operand.vmem [shape: f32[1,128], index: 2, kind: input, shape index: {}]   ;;  %s517_s3 = inlined_call_operand.hbm [shape: f32[128,128], index: 3, kind: input, shape index: {}]   ;;  %s518_s4 = inlined_call_operand.vmem [shape: f32[1,128], index: 4, kind: input, shape index: {}]   ;;  %s519_s5 = inlined_call_operand.vmem [shape: f32[8,128], index: 5, kind: output, shape index: {}]  }
   0x1   :  { %11 = vsyncpa [#allocation5], 0  ;;  %s425_s18 = smov [#allocation4]   ;;  %s355_s22 = scalar_lea.hbm %s515_s1, 512 }
   0x2   :  { %s27_s19 = sshll.u32 %s425_s18, 4  ;;  %p356_p0 = scmp.ne.s32.totalorder %s515_s1, %s355_s22  ;;  %s28_s19 = int_to_ptr.vmem [resolvable:$true] %s27_s19 }
   0x3   :  { %p359_p1 = scmp.lt.u32.totalorder %s355_s22, %s515_s1 }
   0x5   :  { %p361_p2 = pnand %p359_p1, %p356_p0 }
   0x7   :  { %364 = shalt.err (!%p361_p2)
}
   0x8   :  { %s365_s27 = scalar_lea.vmem %s28_s19, 512  ;;  %p370_p4 = scmp.lt.s32.totalorder %s28_s19, %s28_s19 }
   0x9   :  { %p366_p3 = scmp.ne.s32.totalorder %s28_s19, %s365_s27  ;;  %p371_p5 = scmp.lt.s32.totalorder %s365_s27, %s365_s27 }
   0xb   :  { %p372_p6 = por %p371_p5, %p370_p4 }
   0xd   :  { %p373_p7 = pnand %p372_p6, %p366_p3 }
   0xf   :  { %376 = shalt.err (!%p373_p7)
}
  0x10   :  { %s426_s28 = smov 128   ;;  %s427_s29 = smov 8  }
  0x11   :  { %33 = dma.hbm_to_vmem [thread:$0]  %s515_s1, 512, %s28_s19, [#allocation5], %s426_s28, %s426_s28, %s427_s29  }
  0x12   :  { %s428_s7 = smov [#allocation2]   ;;  %s429_s9 = smov [#allocation6]  }
  0x13   :  { %s18_s8 = sshll.u32 %s428_s7, 4  ;;  %s41_s10 = sshll.u32 %s429_s9, 4  ;;  %s19_s8 = int_to_ptr.vmem [resolvable:$true] %s18_s8  ;;  %s42_s10 = int_to_ptr.vmem [resolvable:$true] %s41_s10 }
  0x14   :  { %s377_s13 = scalar_lea.hbm %s514_s0, 128 }
  0x15   :  { %p378_p8 = scmp.ne.s32.totalorder %s514_s0, %s377_s13  ;;  %p381_p9 = scmp.lt.u32.totalorder %s377_s13, %s514_s0 }
  0x17   :  { %p383_p10 = pnand %p381_p9, %p378_p8 }
  0x19   :  { %386 = shalt.err (!%p383_p10)
}
  0x1a   :  { %s387_s1 = scalar_lea.vmem %s19_s8, 128  ;;  %p392_p12 = scmp.lt.s32.totalorder %s19_s8, %s19_s8 }
  0x1b   :  { %p388_p11 = scmp.ne.s32.totalorder %s19_s8, %s387_s1  ;;  %p393_p13 = scmp.lt.s32.totalorder %s387_s1, %s387_s1 }
  0x1d   :  { %p394_p0 = por %p393_p13, %p392_p12 }
  0x1f   :  { %p395_p1 = pnand %p394_p0, %p388_p11 }
  0x21   :  { %398 = shalt.err (!%p395_p1)
}
  0x22   :  { %21 = dma.hbm_to_vmem [thread:$0]  %s514_s0, 128, %s19_s8, [#allocation3]  }
  0x23   :  { %s399_s22 = scalar_lea.hbm %s517_s3, 2048 }
  0x24   :  { %p400_p2 = scmp.ne.s32.totalorder %s517_s3, %s399_s22  ;;  %p403_p3 = scmp.lt.u32.totalorder %s399_s22, %s517_s3 }
  0x26   :  { %p405_p4 = pnand %p403_p3, %p400_p2 }
  0x28   :  { %408 = shalt.err (!%p405_p4)
}
  0x29   :  { %s409_s27 = scalar_lea.vmem %s42_s10, 2048  ;;  %p414_p6 = scmp.lt.s32.totalorder %s42_s10, %s42_s10 }
  0x2a   :  { %p410_p5 = scmp.ne.s32.totalorder %s42_s10, %s409_s27  ;;  %p415_p7 = scmp.lt.s32.totalorder %s409_s27, %s409_s27 }
  0x2c   :  { %p416_p8 = por %p415_p7, %p414_p6 }
  0x2e   :  { %p417_p9 = pnand %p416_p8, %p410_p5 }
  0x30   :  { %420 = shalt.err (!%p417_p9)
}
  0x31   :  { %47 = dma.hbm_to_vmem [thread:$0]  %s517_s3, 2048, %s42_s10, [#allocation5], %s426_s28, %s426_s28, %s427_s29  }
  0x32   :  { %421 = dma.done.wait [#allocation3], 128  }
  0x33   :  { %422 = vsyncadd [#allocation3], 4294967168 }
  0x34   :  { %423 = dma.done.wait [#allocation5], 2560  }
  0x35   :  { %424 = vsyncadd [#allocation5], 4294964736  ;;  %v430_v0 = vmov 0.0|0.0   ;;  %vm431_vm0 = vmmov 0   ;;  %v432_v1 = vmov 0.0   ;;  %v60_v2 = vld [vmem:[#allocation4] sm:$0xff] }
  0x36   :  { %317 = vmatprep.subr.bf16.mxu0 %v430_v0  ;;  %279 = vmatprep.mubr.msk.f32.mxu0 %vm431_vm0, %v432_v1  ;;  %v61_v3 = vld [vmem:[#allocation4 + $0x8] sm:$0xff]  ;;  %v62_v4 = vld [vmem:[#allocation4 + $0x10] sm:$0xff]  ;;  %v63_v6 = vld [vmem:[#allocation4 + $0x18] sm:$0xff]  ;;  %vm71_vm1 = vcmask 261120  }
  0x37   :  { %323 = vmatprep.subr.bf16.mxu1 %v430_v0  ;;  %314 = vmatprep.mubr.msk.f32.mxu1 %vm431_vm0, %v432_v1  ;;  %v318_v5 = vpack.c.bf16 %v61_v3, %v60_v2  ;;  %v146_v7 = vld [vmem:[#allocation6] sm:$0xff]  ;;  %v147_v8 = vld [vmem:[#allocation6 + $0x8] sm:$0xff]  ;;  %v148_v9 = vld [vmem:[#allocation6 + $0x10] sm:$0xff]  ;;  %v321_v11 = vpack.c.bf16 %v63_v6, %v62_v4 }
  0x38   :  { %v149_v10 = vld [vmem:[#allocation6 + $0x18] sm:$0xff]  ;;  %v324_v12 = vpack.c.bf16 %v147_v8, %v146_v7  ;;  %v150_v14 = vld [vmem:[#allocation6 + $0x20] sm:$0xff]  ;;  %v151_v15 = vld [vmem:[#allocation6 + $0x28] sm:$0xff] }
  0x39   :  { %319 = vmatpush3.bf16.msra.mxu0 %v318_v5  ;;  %v327_v13 = vpack.c.bf16 %v149_v10, %v148_v9  ;;  %v59_v16 = vld [vmem:[#allocation2] sm:$0xff]  ;;  %v330_v17 = vpack.c.bf16 %v151_v15, %v150_v14  ;;  %v152_v18 = vld [vmem:[#allocation6 + $0x30] sm:$0xff]  ;;  %v154_v21 = vld [vmem:[#allocation6 + $0x40] sm:$0xff] }
  0x3a   :  { %320 = vmatprep.subr.bf16.mxu0 %v430_v0  ;;  %325 = vmatpush3.bf16.msra.mxu1 %v324_v12  ;;  %v153_v19 = vld [vmem:[#allocation6 + $0x38] sm:$0xff]  ;;  %v155_v22 = vld [vmem:[#allocation6 + $0x48] sm:$0xff]  ;;  %v156_v24 = vld [vmem:[#allocation6 + $0x50] sm:$0xff] }
  0x3b   :  { %326 = vmatprep.subr.bf16.mxu1 %v430_v0  ;;  %v333_v20 = vpack.c.bf16 %v153_v19, %v152_v18  ;;  %v336_v23 = vpack.c.bf16 %v155_v22, %v154_v21  ;;  %v157_v25 = vld [vmem:[#allocation6 + $0x58] sm:$0xff]  ;;  %v158_v27 = vld [vmem:[#allocation6 + $0x60] sm:$0xff]  ;;  %v159_v28 = vld [vmem:[#allocation6 + $0x68] sm:$0xff] }
  0x3c   :  { %v339_v26 = vpack.c.bf16 %v157_v25, %v156_v24  ;;  %v342_v29 = vpack.c.bf16 %v159_v28, %v158_v27  ;;  %v160_v30 = vld [vmem:[#allocation6 + $0x70] sm:$0xff]  ;;  %v161_v31 = vld [vmem:[#allocation6 + $0x78] sm:$0xff] }
  0x3d   :  { %322 = vmatpush3.bf16.msra.mxu0 %v321_v11  ;;  %v345_v32 = vpack.c.bf16 %v161_v31, %v160_v30  ;;  %v246_v33 = vld [vmem:[%s516_s2] ss:$0 sm:$0xff] }
  0x3e   :  { %328 = vmatpush3.bf16.msra.mxu1 %v327_v13  ;;  %v248_v38 = vld [vmem:[%s518_s4] ss:$0 sm:$0xff] }
  0x3f   :  { %329 = vmatprep.subr.bf16.mxu1 %v430_v0 }
  0x40   :  { %280 = vmatmul.mubr.msk.f32.vlgmr.msra.gmra.mrb[0].mxu0 %vm71_vm1, %v59_v16 }
  0x42   :  { %331 = vmatpush3.bf16.msra.mxu1 %v330_v17 }
  0x43   :  { %332 = vmatprep.subr.bf16.mxu1 %v430_v0 }
  0x46   :  { %334 = vmatpush3.bf16.msra.mxu1 %v333_v20 }
  0x47   :  { %335 = vmatprep.subr.bf16.mxu1 %v430_v0 }
  0x4a   :  { %337 = vmatpush3.bf16.msra.mxu1 %v336_v23 }
  0x4b   :  { %338 = vmatprep.subr.bf16.mxu1 %v430_v0 }
  0x4e   :  { %340 = vmatpush3.bf16.msra.mxu1 %v339_v26 }
  0x4f   :  { %341 = vmatprep.subr.bf16.mxu1 %v430_v0 }
  0x52   :  { %343 = vmatpush3.bf16.msra.mxu1 %v342_v29 }
  0x53   :  { %344 = vmatprep.subr.bf16.mxu1 %v430_v0 }
  0x56   :  { %346 = vmatpush3.bf16.msra.mxu1 %v345_v32 }
 0x113   :  { %v141_v34 = vpop.f32.mrb[0].mxu0 }
 0x114   :  { %v142_v35 = vadd.f32 %v246_v33, %v141_v34  ;;  %v281_v36 = vpop.f32.mrb[1].mxu0 }
 0x116   :  { %v145_v37 = vmax.f32 %v142_v35, 0.0 }
 0x118   :  { %315 = vmatmul.mubr.f32.vlgmr.msra.gmra.mrb[0].mxu1 %v145_v37 }
 0x1eb   :  { %v235_v39 = vpop.f32.mrb[0].mxu1 }
 0x1ec   :  { %v236_v40 = vadd.f32 %v248_v38, %v235_v39  ;;  %v316_v41 = vpop.f32.mrb[1].mxu1 }
 0x1ee   :  { %239 = vst [vmem:[%s519_s5] sm:$0xff] %v236_v40 }
 0x1ef   :  { %244 = vsyncpa [#allocation3], 1 }
 0x1f0   :  { %245 = vsyncpa [#allocation5], 1 }

// kernel: _encoder_forward_impl.1
= control target key start
LH: loop header
LB: loop body
LE: loop exit
PB: predicated region body
PF: predicated region fallthrough
CT: control target
= control target key end

     0   :  { %10 = vsyncpa [#allocation3], 0  ;;  %s514_s0 = inlined_call_operand.hbm [shape: f32[8,32], index: 0, kind: input, shape index: {}]   ;;  %s515_s1 = inlined_call_operand.hbm [shape: f32[32,128], index: 1, kind: input, shape index: {}]   ;;  %s516_s2 = inlined_call_operand.vmem [shape: f32[1,128], index: 2, kind: input, shape index: {}]   ;;  %s517_s3 = inlined_call_operand.hbm [shape: f32[128,128], index: 3, kind: input, shape index: {}]   ;;  %s518_s4 = inlined_call_operand.vmem [shape: f32[1,128], index: 4, kind: input, shape index: {}]   ;;  %s519_s5 = inlined_call_operand.vmem [shape: f32[8,128], index: 5, kind: output, shape index: {}]  }
   0x1   :  { %11 = vsyncpa [#allocation5], 0  ;;  %s425_s18 = smov [#allocation4]   ;;  %s355_s22 = scalar_lea.hbm %s515_s1, 512 }
   0x2   :  { %s27_s19 = sshll.u32 %s425_s18, 4  ;;  %p356_p0 = scmp.ne.s32.totalorder %s515_s1, %s355_s22  ;;  %s28_s19 = int_to_ptr.vmem [resolvable:$true] %s27_s19 }
   0x3   :  { %p359_p1 = scmp.lt.u32.totalorder %s355_s22, %s515_s1 }
   0x5   :  { %p361_p2 = pnand %p359_p1, %p356_p0 }
   0x7   :  { %364 = shalt.err (!%p361_p2)
}
   0x8   :  { %s365_s27 = scalar_lea.vmem %s28_s19, 512  ;;  %p370_p4 = scmp.lt.s32.totalorder %s28_s19, %s28_s19 }
   0x9   :  { %p366_p3 = scmp.ne.s32.totalorder %s28_s19, %s365_s27  ;;  %p371_p5 = scmp.lt.s32.totalorder %s365_s27, %s365_s27 }
   0xb   :  { %p372_p6 = por %p371_p5, %p370_p4 }
   0xd   :  { %p373_p7 = pnand %p372_p6, %p366_p3 }
   0xf   :  { %376 = shalt.err (!%p373_p7)
}
  0x10   :  { %s426_s28 = smov 128   ;;  %s427_s29 = smov 8  }
  0x11   :  { %33 = dma.hbm_to_vmem [thread:$0]  %s515_s1, 512, %s28_s19, [#allocation5], %s426_s28, %s426_s28, %s427_s29  }
  0x12   :  { %s428_s7 = smov [#allocation2]   ;;  %s429_s9 = smov [#allocation6]  }
  0x13   :  { %s18_s8 = sshll.u32 %s428_s7, 4  ;;  %s41_s10 = sshll.u32 %s429_s9, 4  ;;  %s19_s8 = int_to_ptr.vmem [resolvable:$true] %s18_s8  ;;  %s42_s10 = int_to_ptr.vmem [resolvable:$true] %s41_s10 }
  0x14   :  { %s377_s13 = scalar_lea.hbm %s514_s0, 128 }
  0x15   :  { %p378_p8 = scmp.ne.s32.totalorder %s514_s0, %s377_s13  ;;  %p381_p9 = scmp.lt.u32.totalorder %s377_s13, %s514_s0 }
  0x17   :  { %p383_p10 = pnand %p381_p9, %p378_p8 }
  0x19   :  { %386 = shalt.err (!%p383_p10)
}
  0x1a   :  { %s387_s1 = scalar_lea.vmem %s19_s8, 128  ;;  %p392_p12 = scmp.lt.s32.totalorder %s19_s8, %s19_s8 }
  0x1b   :  { %p388_p11 = scmp.ne.s32.totalorder %s19_s8, %s387_s1  ;;  %p393_p13 = scmp.lt.s32.totalorder %s387_s1, %s387_s1 }
  0x1d   :  { %p394_p0 = por %p393_p13, %p392_p12 }
  0x1f   :  { %p395_p1 = pnand %p394_p0, %p388_p11 }
  0x21   :  { %398 = shalt.err (!%p395_p1)
}
  0x22   :  { %21 = dma.hbm_to_vmem [thread:$0]  %s514_s0, 128, %s19_s8, [#allocation3]  }
  0x23   :  { %s399_s22 = scalar_lea.hbm %s517_s3, 2048 }
  0x24   :  { %p400_p2 = scmp.ne.s32.totalorder %s517_s3, %s399_s22  ;;  %p403_p3 = scmp.lt.u32.totalorder %s399_s22, %s517_s3 }
  0x26   :  { %p405_p4 = pnand %p403_p3, %p400_p2 }
  0x28   :  { %408 = shalt.err (!%p405_p4)
}
  0x29   :  { %s409_s27 = scalar_lea.vmem %s42_s10, 2048  ;;  %p414_p6 = scmp.lt.s32.totalorder %s42_s10, %s42_s10 }
  0x2a   :  { %p410_p5 = scmp.ne.s32.totalorder %s42_s10, %s409_s27  ;;  %p415_p7 = scmp.lt.s32.totalorder %s409_s27, %s409_s27 }
  0x2c   :  { %p416_p8 = por %p415_p7, %p414_p6 }
  0x2e   :  { %p417_p9 = pnand %p416_p8, %p410_p5 }
  0x30   :  { %420 = shalt.err (!%p417_p9)
}
  0x31   :  { %47 = dma.hbm_to_vmem [thread:$0]  %s517_s3, 2048, %s42_s10, [#allocation5], %s426_s28, %s426_s28, %s427_s29  }
  0x32   :  { %421 = dma.done.wait [#allocation3], 128  }
  0x33   :  { %422 = vsyncadd [#allocation3], 4294967168 }
  0x34   :  { %423 = dma.done.wait [#allocation5], 2560  }
  0x35   :  { %424 = vsyncadd [#allocation5], 4294964736  ;;  %v430_v0 = vmov 0.0|0.0   ;;  %vm431_vm0 = vmmov 0   ;;  %v432_v1 = vmov 0.0   ;;  %v60_v2 = vld [vmem:[#allocation4] sm:$0xff] }
  0x36   :  { %317 = vmatprep.subr.bf16.mxu0 %v430_v0  ;;  %279 = vmatprep.mubr.msk.f32.mxu0 %vm431_vm0, %v432_v1  ;;  %v61_v3 = vld [vmem:[#allocation4 + $0x8] sm:$0xff]  ;;  %v62_v4 = vld [vmem:[#allocation4 + $0x10] sm:$0xff]  ;;  %v63_v6 = vld [vmem:[#allocation4 + $0x18] sm:$0xff]  ;;  %vm71_vm1 = vcmask 261120  }
  0x37   :  { %323 = vmatprep.subr.bf16.mxu1 %v430_v0  ;;  %314 = vmatprep.mubr.msk.f32.mxu1 %vm431_vm0, %v432_v1  ;;  %v318_v5 = vpack.c.bf16 %v61_v3, %v60_v2  ;;  %v146_v7 = vld [vmem:[#allocation6] sm:$0xff]  ;;  %v147_v8 = vld [vmem:[#allocation6 + $0x8] sm:$0xff]  ;;  %v148_v9 = vld [vmem:[#allocation6 + $0x10] sm:$0xff]  ;;  %v321_v11 = vpack.c.bf16 %v63_v6, %v62_v4 }
  0x38   :  { %v149_v10 = vld [vmem:[#allocation6 + $0x18] sm:$0xff]  ;;  %v324_v12 = vpack.c.bf16 %v147_v8, %v146_v7  ;;  %v150_v14 = vld [vmem:[#allocation6 + $0x20] sm:$0xff]  ;;  %v151_v15 = vld [vmem:[#allocation6 + $0x28] sm:$0xff] }
  0x39   :  { %319 = vmatpush3.bf16.msra.mxu0 %v318_v5  ;;  %v327_v13 = vpack.c.bf16 %v149_v10, %v148_v9  ;;  %v59_v16 = vld [vmem:[#allocation2] sm:$0xff]  ;;  %v330_v17 = vpack.c.bf16 %v151_v15, %v150_v14  ;;  %v152_v18 = vld [vmem:[#allocation6 + $0x30] sm:$0xff]  ;;  %v154_v21 = vld [vmem:[#allocation6 + $0x40] sm:$0xff] }
  0x3a   :  { %320 = vmatprep.subr.bf16.mxu0 %v430_v0  ;;  %325 = vmatpush3.bf16.msra.mxu1 %v324_v12  ;;  %v153_v19 = vld [vmem:[#allocation6 + $0x38] sm:$0xff]  ;;  %v155_v22 = vld [vmem:[#allocation6 + $0x48] sm:$0xff]  ;;  %v156_v24 = vld [vmem:[#allocation6 + $0x50] sm:$0xff] }
  0x3b   :  { %326 = vmatprep.subr.bf16.mxu1 %v430_v0  ;;  %v333_v20 = vpack.c.bf16 %v153_v19, %v152_v18  ;;  %v336_v23 = vpack.c.bf16 %v155_v22, %v154_v21  ;;  %v157_v25 = vld [vmem:[#allocation6 + $0x58] sm:$0xff]  ;;  %v158_v27 = vld [vmem:[#allocation6 + $0x60] sm:$0xff]  ;;  %v159_v28 = vld [vmem:[#allocation6 + $0x68] sm:$0xff] }
  0x3c   :  { %v339_v26 = vpack.c.bf16 %v157_v25, %v156_v24  ;;  %v342_v29 = vpack.c.bf16 %v159_v28, %v158_v27  ;;  %v160_v30 = vld [vmem:[#allocation6 + $0x70] sm:$0xff]  ;;  %v161_v31 = vld [vmem:[#allocation6 + $0x78] sm:$0xff] }
  0x3d   :  { %322 = vmatpush3.bf16.msra.mxu0 %v321_v11  ;;  %v345_v32 = vpack.c.bf16 %v161_v31, %v160_v30  ;;  %v246_v33 = vld [vmem:[%s516_s2] ss:$0 sm:$0xff] }
  0x3e   :  { %328 = vmatpush3.bf16.msra.mxu1 %v327_v13  ;;  %v248_v38 = vld [vmem:[%s518_s4] ss:$0 sm:$0xff] }
  0x3f   :  { %329 = vmatprep.subr.bf16.mxu1 %v430_v0 }
  0x40   :  { %280 = vmatmul.mubr.msk.f32.vlgmr.msra.gmra.mrb[0].mxu0 %vm71_vm1, %v59_v16 }
  0x42   :  { %331 = vmatpush3.bf16.msra.mxu1 %v330_v17 }
  0x43   :  { %332 = vmatprep.subr.bf16.mxu1 %v430_v0 }
  0x46   :  { %334 = vmatpush3.bf16.msra.mxu1 %v333_v20 }
  0x47   :  { %335 = vmatprep.subr.bf16.mxu1 %v430_v0 }
  0x4a   :  { %337 = vmatpush3.bf16.msra.mxu1 %v336_v23 }
  0x4b   :  { %338 = vmatprep.subr.bf16.mxu1 %v430_v0 }
  0x4e   :  { %340 = vmatpush3.bf16.msra.mxu1 %v339_v26 }
  0x4f   :  { %341 = vmatprep.subr.bf16.mxu1 %v430_v0 }
  0x52   :  { %343 = vmatpush3.bf16.msra.mxu1 %v342_v29 }
  0x53   :  { %344 = vmatprep.subr.bf16.mxu1 %v430_v0 }
  0x56   :  { %346 = vmatpush3.bf16.msra.mxu1 %v345_v32 }
 0x113   :  { %v141_v34 = vpop.f32.mrb[0].mxu0 }
 0x114   :  { %v142_v35 = vadd.f32 %v246_v33, %v141_v34  ;;  %v281_v36 = vpop.f32.mrb[1].mxu0 }
 0x116   :  { %v145_v37 = vmax.f32 %v142_v35, 0.0 }
 0x118   :  { %315 = vmatmul.mubr.f32.vlgmr.msra.gmra.mrb[0].mxu1 %v145_v37 }
 0x1eb   :  { %v235_v39 = vpop.f32.mrb[0].mxu1 }
 0x1ec   :  { %v236_v40 = vadd.f32 %v248_v38, %v235_v39  ;;  %v316_v41 = vpop.f32.mrb[1].mxu1 }
 0x1ee   :  { %239 = vst [vmem:[%s519_s5] sm:$0xff] %v236_v40 }
 0x1ef   :  { %244 = vsyncpa [#allocation3], 1 }
 0x1f0   :  { %245 = vsyncpa [#allocation5], 1 }

</bundles_post_ra>
